<compile_context>
chip_gen: v5e
topology: v5e:2x2
jax: 0.10.0
libtpu: 0.0.40
codegen_flags: <defaults>
</compile_context>

<pallas_src>
import functools
import math

import jax
import jax.numpy as jnp
from jax.experimental import pallas as pl
from jax.experimental.pallas import tpu as pltpu


def _round_up(x, m):
    return (x + m - 1) // m * m


def _gated_fusion_kernel(f1_ref, f2_ref, w1_ref, w2_ref, b_ref, g_ref, beta_ref,
                         o_ref, *, eps, inv_d):
    # Blocks: f1/f2/out (TR, D); w1t/w2t (D, D) resident; b/gamma/beta (1, D) f32.
    # cat(f1, f2) @ W.T + b  ==  f1 @ W1t + f2 @ W2t + b   (no concat / transpose in-kernel)
    x = jnp.dot(f1_ref[...], w1_ref[...], preferred_element_type=jnp.float32)
    x = x + jnp.dot(f2_ref[...], w2_ref[...], preferred_element_type=jnp.float32)
    x = x + b_ref[...]

    # LayerNorm over the feature (lane) axis: one-pass sum / sum-of-squares, f32 math.
    s = jnp.sum(x, axis=-1, keepdims=True)
    ss = jnp.sum(x * x, axis=-1, keepdims=True)
    mean = s * inv_d
    var = jnp.maximum(ss * inv_d - mean * mean, 0.0)
    inv = jax.lax.rsqrt(var + eps)                      # EUP rsqrt (free-ish slot)
    y = (x - mean) * inv * g_ref[...] + beta_ref[...]

    # ReLU; Dropout(p=0.1) is identity at inference time.
    o_ref[...] = jnp.maximum(y, 0.0).astype(o_ref.dtype)


def prepare_gated_fusion_params(w, b, gamma, beta, *, stream_dtype=jnp.bfloat16):
    """One-time parameter preparation (hoisted out of the per-call path).

    w: PyTorch Linear weight, shape (d_model, 2*d_model).
    Returns (w1t, w2t, b2, g2, beta2): the fused-input weight split into its two halves,
    pre-transposed and cast to `stream_dtype`; bias / LayerNorm vectors kept in f32.
    """
    D = w.shape[0]
    assert w.shape == (D, 2 * D), "Linear weight must be (d_model, 2*d_model)"
    w1t = w[:, :D].T.astype(stream_dtype)    # (D, D): multiplies feature1
    w2t = w[:, D:].T.astype(stream_dtype)    # (D, D): multiplies feature2
    b2 = b.reshape(1, D).astype(jnp.float32)
    g2 = gamma.reshape(1, D).astype(jnp.float32)
    beta2 = beta.reshape(1, D).astype(jnp.float32)
    return w1t, w2t, b2, g2, beta2


def _derive_row_tile_and_vmem(R, D, stream_bytes, out_bytes, *,
                              max_row_tile=1024, vmem_budget=32 * 1024 * 1024):
    # Resident (single-buffered) constants: two DxD stream-dtype weights + 3 f32 vectors.
    resident = 2 * D * D * stream_bytes + 3 * D * 4
    # Per-row bytes of the double-buffered pipelined blocks (f1 + f2 in, out).
    per_row = 2 * D * (2 * stream_bytes + out_bytes)
    avail = max(vmem_budget - resident, 8 * per_row)
    tr_budget = max(8, (avail // per_row) // 8 * 8)
    # Keep >= 2 grid steps so v7x's two TensorCores both get work.
    tr_split = _round_up(pl.cdiv(R, 2), 8)
    tr = int(min(max_row_tile, tr_budget, max(tr_split, 8)))
    tr = max(8, min(tr, _round_up(R, 8)))
    # Explicit scoped-VMEM limit: generous headroom, floor at v5e's 16 MiB default,
    # never above v7x's 64 MiB physical.
    vmem_limit = int(min(max(2 * resident + per_row * tr + (8 << 20), 16 << 20), 64 << 20))
    return tr, vmem_limit


def gated_fusion(feature1, feature2, prepared_params, *, eps=1e-5,
                 max_row_tile=1024, vmem_budget=32 * 1024 * 1024):
    """Pallas implementation of GatedFusion.forward (inference).

    feature1 / feature2: (..., d_model). prepared_params from prepare_gated_fusion_params().
    Returns an array with the same shape and dtype as feature1.
    """
    assert feature1.shape == feature2.shape, "feature1/feature2 must share a shape"
    *lead, D = feature1.shape
    w1t, w2t, b2, g2, beta2 = prepared_params
    assert w1t.shape == (D, D) and w2t.shape == (D, D)

    stream_dtype = w1t.dtype
    out_dtype = feature1.dtype

    # Collapse all leading dims into one row axis -> lane/sublane-dense 2-D slab.
    # (D a multiple of 128 is the lane-dense fast path; D=128 here.)
    R = math.prod(lead) if lead else 1
    f1_2d = feature1.reshape(R, D).astype(stream_dtype)
    f2_2d = feature2.reshape(R, D).astype(stream_dtype)

    stream_bytes = jnp.dtype(stream_dtype).itemsize
    out_bytes = jnp.dtype(out_dtype).itemsize
    tr, vmem_limit = _derive_row_tile_and_vmem(
        R, D, stream_bytes, out_bytes,
        max_row_tile=max_row_tile, vmem_budget=vmem_budget)
    grid = (pl.cdiv(R, tr),)

    # Advisory cost estimate (2 GEMMs + LayerNorm/ReLU elementwise).
    flops = 2 * R * D * (2 * D) + 10 * R * D
    bytes_accessed = (2 * R * D + 2 * D * D) * stream_bytes + R * D * out_bytes + 3 * D * 4
    cost = pl.CostEstimate(flops=flops, transcendentals=R, bytes_accessed=bytes_accessed)

    kernel = functools.partial(_gated_fusion_kernel, eps=eps, inv_d=1.0 / D)

    def run(const_mode):
        row_spec = pl.BlockSpec((tr, D), lambda r: (r, 0))

        def const_spec(shape):
            idx = lambda r: (0,) * len(shape)
            if const_mode is None:
                return pl.BlockSpec(shape, idx)
            return pl.BlockSpec(shape, idx, pipeline_mode=const_mode)

        return pl.pallas_call(
            kernel,
            out_shape=jax.ShapeDtypeStruct((R, D), out_dtype),
            grid_spec=pltpu.PrefetchScalarGridSpec(
                num_scalar_prefetch=0,
                grid=grid,
                in_specs=[
                    row_spec,            # feature1 rows (stream dtype)
                    row_spec,            # feature2 rows (stream dtype)
                    const_spec((D, D)),  # W1^T (resident)
                    const_spec((D, D)),  # W2^T (resident)
                    const_spec((1, D)),  # linear bias (f32)
                    const_spec((1, D)),  # LayerNorm gamma (f32)
                    const_spec((1, D)),  # LayerNorm beta (f32)
                ],
                out_specs=row_spec,
            ),
            compiler_params=pltpu.CompilerParams(
                dimension_semantics=("parallel",),
                vmem_limit_bytes=vmem_limit),
            cost_estimate=cost,
        )(f1_2d, f2_2d, w1t, w2t, b2, g2, beta2)

    try:
        # Constant-index blocks only need one VMEM buffer; frees 2*D*D*bytes of VMEM
        # headroom for bigger row tiles (matters most on v7x's 64 MiB VMEM).
        out2d = run(pl.Buffered(1))
    except Exception:
        # Fallback for Pallas builds that reject buffer_count=1 / lack pl.Buffered.
        out2d = run(None)

    return out2d.reshape(*lead, D) if lead else out2d.reshape(D)


def gated_fusion_ref(feature1, feature2, params, *, eps=1e-5):
    """Pure-JAX reference mirroring the PyTorch eval-mode forward."""
    w, b, gamma, beta = params
    x = jnp.concatenate([feature1, feature2], axis=-1) @ w.T + b
    mean = x.mean(-1, keepdims=True)
    var = ((x - mean) ** 2).mean(-1, keepdims=True)
    y = (x - mean) / jnp.sqrt(var + eps) * gamma + beta
    return jnp.maximum(y, 0.0)


if __name__ == "__main__":
    # Small, lane-dense shapes consistent with the module: d_model=128, B=2, seq=8.
    d_model = 128
    B, N = 2, 8

    key = jax.random.PRNGKey(0)
    k1, k2, kw, kb, kg, kbe = jax.random.split(key, 6)

    f1 = jax.random.normal(k1, (B, N, d_model), dtype=jnp.float32)
    f2 = jax.random.normal(k2, (B, N, d_model), dtype=jnp.float32)

    s = 0.1
    w = s * jax.random.normal(kw, (d_model, 2 * d_model), dtype=jnp.float32)
    b = s * jax.random.normal(kb, (d_model,), dtype=jnp.float32)
    gamma = 1.0 + s * jax.random.normal(kg, (d_model,), dtype=jnp.float32)
    beta = s * jax.random.normal(kbe, (d_model,), dtype=jnp.float32)
    params = (w, b, gamma, beta)

    # 1) f32 streaming path: strict check against the pure-JAX reference.
    #    (R=16 rows -> tr=8 -> 2-step parallel grid, exercising the pipeline.)
    prep_f32 = prepare_gated_fusion_params(w, b, gamma, beta, stream_dtype=jnp.float32)
    out_f32 = jax.block_until_ready(gated_fusion(f1, f2, prep_f32))
    ref_f32 = gated_fusion_ref(f1, f2, params)
    assert out_f32.shape == (B, N, d_model)
    assert jnp.allclose(out_f32, ref_f32, atol=2e-3, rtol=2e-3), "f32 path mismatch"

    # 2) bf16 streaming path (production default, ~2x less HBM traffic): checked against
    #    a reference computed on the same bf16-rounded operands (f32 accumulation).
    prep_bf16 = prepare_gated_fusion_params(w, b, gamma, beta, stream_dtype=jnp.bfloat16)
    out_bf16 = jax.block_until_ready(gated_fusion(f1, f2, prep_bf16))
    rb = lambda a: a.astype(jnp.bfloat16).astype(jnp.float32)
    ref_bf16 = gated_fusion_ref(rb(f1), rb(f2), (rb(w), b, gamma, beta))
    assert out_bf16.shape == (B, N, d_model)
    assert jnp.allclose(out_bf16, ref_bf16, atol=1e-2, rtol=1e-2), "bf16 path mismatch"

    print("KERNEL_OK")
</pallas_src>

<mosaic_0001>
module attributes {stable_mosaic.version = 11 : i64} {
  func.func @_gated_fusion_kernel(%arg0: i32, %arg1: memref<8x128xf32, #tpu.memory_space<vmem>>, %arg2: memref<8x128xf32, #tpu.memory_space<vmem>>, %arg3: memref<128x128xf32, #tpu.memory_space<vmem>>, %arg4: memref<128x128xf32, #tpu.memory_space<vmem>>, %arg5: memref<1x128xf32, #tpu.memory_space<vmem>>, %arg6: memref<1x128xf32, #tpu.memory_space<vmem>>, %arg7: memref<1x128xf32, #tpu.memory_space<vmem>>, %arg8: memref<8x128xf32, #tpu.memory_space<vmem>>) attributes {dimension_semantics = [#tpu.dimension_semantics<parallel>], iteration_bounds = array<i64: 2>, scalar_prefetch = 0 : i64, scratch_operands = 0 : i64, tpu.core_type = #tpu.core_type<tc>, window_params = [{transform_indices = @transform_0, window_bounds = array<i64: 8, 128>}, {transform_indices = @transform_1, window_bounds = array<i64: 8, 128>}, {pipeline_mode = #tpu.pipeline_mode<synchronous>, transform_indices = @transform_2, window_bounds = array<i64: 128, 128>}, {pipeline_mode = #tpu.pipeline_mode<synchronous>, transform_indices = @transform_3, window_bounds = array<i64: 128, 128>}, {pipeline_mode = #tpu.pipeline_mode<synchronous>, transform_indices = @transform_4, window_bounds = array<i64: 1, 128>}, {pipeline_mode = #tpu.pipeline_mode<synchronous>, transform_indices = @transform_5, window_bounds = array<i64: 1, 128>}, {pipeline_mode = #tpu.pipeline_mode<synchronous>, transform_indices = @transform_6, window_bounds = array<i64: 1, 128>}, {transform_indices = @transform_7, window_bounds = array<i64: 8, 128>}]} {
    %c0 = arith.constant 0 : index
    %c0_0 = arith.constant 0 : index
    %0 = vector.load %arg1[%c0, %c0_0] : memref<8x128xf32, #tpu.memory_space<vmem>>, vector<8x128xf32>
    %c0_1 = arith.constant 0 : index
    %c0_2 = arith.constant 0 : index
    %1 = vector.load %arg3[%c0_1, %c0_2] : memref<128x128xf32, #tpu.memory_space<vmem>>, vector<128x128xf32>
    %cst = arith.constant dense<0.000000e+00> : vector<8x128xf32>
    %2 = tpu.matmul %0, %1, %cst {dimension_numbers = #tpu.dot_dimension_numbers<[1], [0], [0], [1], [0, 0, 1, 1], [], []>} : vector<8x128xf32>, vector<128x128xf32>, vector<8x128xf32> -> vector<8x128xf32>
    %c0_3 = arith.constant 0 : index
    %c0_4 = arith.constant 0 : index
    %3 = vector.load %arg2[%c0_3, %c0_4] : memref<8x128xf32, #tpu.memory_space<vmem>>, vector<8x128xf32>
    %c0_5 = arith.constant 0 : index
    %c0_6 = arith.constant 0 : index
    %4 = vector.load %arg4[%c0_5, %c0_6] : memref<128x128xf32, #tpu.memory_space<vmem>>, vector<128x128xf32>
    %cst_7 = arith.constant dense<0.000000e+00> : vector<8x128xf32>
    %5 = tpu.matmul %3, %4, %cst_7 {dimension_numbers = #tpu.dot_dimension_numbers<[1], [0], [0], [1], [0, 0, 1, 1], [], []>} : vector<8x128xf32>, vector<128x128xf32>, vector<8x128xf32> -> vector<8x128xf32>
    %6 = arith.addf %2, %5 : vector<8x128xf32>
    %c0_8 = arith.constant 0 : index
    %c0_9 = arith.constant 0 : index
    %7 = vector.load %arg5[%c0_8, %c0_9] : memref<1x128xf32, #tpu.memory_space<vmem>>, vector<1x128xf32>
    %8 = vector.broadcast %7 : vector<1x128xf32> to vector<8x128xf32>
    %9 = arith.addf %6, %8 : vector<8x128xf32>
    %cst_10 = arith.constant dense<0.000000e+00> : vector<8xf32>
    %10 = vector.multi_reduction <add>, %9, %cst_10 [1] : vector<8x128xf32> to vector<8xf32>
    %11 = vector.shape_cast %10 : vector<8xf32> to vector<8x1xf32>
    %12 = arith.mulf %9, %9 : vector<8x128xf32>
    %cst_11 = arith.constant dense<0.000000e+00> : vector<8xf32>
    %13 = vector.multi_reduction <add>, %12, %cst_11 [1] : vector<8x128xf32> to vector<8xf32>
    %14 = vector.shape_cast %13 : vector<8xf32> to vector<8x1xf32>
    %cst_12 = arith.constant 7.812500e-03 : f32
    %15 = vector.broadcast %cst_12 : f32 to vector<8x1xf32>
    %16 = arith.mulf %11, %15 : vector<8x1xf32>
    %cst_13 = arith.constant 7.812500e-03 : f32
    %17 = vector.broadcast %cst_13 : f32 to vector<8x1xf32>
    %18 = arith.mulf %14, %17 : vector<8x1xf32>
    %19 = arith.mulf %16, %16 : vector<8x1xf32>
    %20 = arith.subf %18, %19 : vector<8x1xf32>
    %cst_14 = arith.constant 0.000000e+00 : f32
    %21 = vector.broadcast %cst_14 : f32 to vector<8x1xf32>
    %22 = arith.maximumf %20, %21 : vector<8x1xf32>
    %cst_15 = arith.constant 9.99999974E-6 : f32
    %23 = vector.broadcast %cst_15 : f32 to vector<8x1xf32>
    %24 = arith.addf %22, %23 : vector<8x1xf32>
    %25 = math.rsqrt %24 : vector<8x1xf32>
    %26 = vector.broadcast %16 : vector<8x1xf32> to vector<8x128xf32>
    %27 = arith.subf %9, %26 : vector<8x128xf32>
    %28 = vector.broadcast %25 : vector<8x1xf32> to vector<8x128xf32>
    %29 = arith.mulf %27, %28 : vector<8x128xf32>
    %c0_16 = arith.constant 0 : index
    %c0_17 = arith.constant 0 : index
    %30 = vector.load %arg6[%c0_16, %c0_17] : memref<1x128xf32, #tpu.memory_space<vmem>>, vector<1x128xf32>
    %31 = vector.broadcast %30 : vector<1x128xf32> to vector<8x128xf32>
    %32 = arith.mulf %29, %31 : vector<8x128xf32>
    %c0_18 = arith.constant 0 : index
    %c0_19 = arith.constant 0 : index
    %33 = vector.load %arg7[%c0_18, %c0_19] : memref<1x128xf32, #tpu.memory_space<vmem>>, vector<1x128xf32>
    %34 = vector.broadcast %33 : vector<1x128xf32> to vector<8x128xf32>
    %35 = arith.addf %32, %34 : vector<8x128xf32>
    %cst_20 = arith.constant 0.000000e+00 : f32
    %36 = vector.broadcast %cst_20 : f32 to vector<8x128xf32>
    %37 = arith.maximumf %35, %36 : vector<8x128xf32>
    %c0_21 = arith.constant 0 : index
    %c0_22 = arith.constant 0 : index
    %38 = vector.load %arg8[%c0_21, %c0_22] : memref<8x128xf32, #tpu.memory_space<vmem>>, vector<8x128xf32>
    tpu.vector_store %arg8[%c0_21, %c0_22], %37 {strides = array<i32>} : memref<8x128xf32, #tpu.memory_space<vmem>>, vector<8x128xf32>,
    return
  }
  func.func @transform_0(%arg0: i32) -> (i32, i32) {
    %c0_i32 = arith.constant 0 : i32
    %c0_i32_0 = arith.constant 0 : i32
    return %arg0, %c0_i32 : i32, i32
  }
  func.func @transform_1(%arg0: i32) -> (i32, i32) {
    %c0_i32 = arith.constant 0 : i32
    %c0_i32_0 = arith.constant 0 : i32
    return %arg0, %c0_i32 : i32, i32
  }
  func.func @transform_2(%arg0: i32) -> (i32, i32) {
    %c0_i32 = arith.constant 0 : i32
    %c0_i32_0 = arith.constant 0 : i32
    %c0_i32_1 = arith.constant 0 : i32
    return %c0_i32, %c0_i32_0 : i32, i32
  }
  func.func @transform_3(%arg0: i32) -> (i32, i32) {
    %c0_i32 = arith.constant 0 : i32
    %c0_i32_0 = arith.constant 0 : i32
    %c0_i32_1 = arith.constant 0 : i32
    return %c0_i32, %c0_i32_0 : i32, i32
  }
  func.func @transform_4(%arg0: i32) -> (i32, i32) {
    %c0_i32 = arith.constant 0 : i32
    %c0_i32_0 = arith.constant 0 : i32
    %c0_i32_1 = arith.constant 0 : i32
    return %c0_i32, %c0_i32_0 : i32, i32
  }
  func.func @transform_5(%arg0: i32) -> (i32, i32) {
    %c0_i32 = arith.constant 0 : i32
    %c0_i32_0 = arith.constant 0 : i32
    %c0_i32_1 = arith.constant 0 : i32
    return %c0_i32, %c0_i32_0 : i32, i32
  }
  func.func @transform_6(%arg0: i32) -> (i32, i32) {
    %c0_i32 = arith.constant 0 : i32
    %c0_i32_0 = arith.constant 0 : i32
    %c0_i32_1 = arith.constant 0 : i32
    return %c0_i32, %c0_i32_0 : i32, i32
  }
  func.func @transform_7(%arg0: i32) -> (i32, i32) {
    %c0_i32 = arith.constant 0 : i32
    %c0_i32_0 = arith.constant 0 : i32
    return %arg0, %c0_i32 : i32, i32
  }
}

module attributes {stable_mosaic.version = 11 : i64} {
  func.func @_gated_fusion_kernel(%arg0: i32, %arg1: memref<8x128xf32, #tpu.memory_space<vmem>>, %arg2: memref<8x128xf32, #tpu.memory_space<vmem>>, %arg3: memref<128x128xf32, #tpu.memory_space<vmem>>, %arg4: memref<128x128xf32, #tpu.memory_space<vmem>>, %arg5: memref<1x128xf32, #tpu.memory_space<vmem>>, %arg6: memref<1x128xf32, #tpu.memory_space<vmem>>, %arg7: memref<1x128xf32, #tpu.memory_space<vmem>>, %arg8: memref<8x128xf32, #tpu.memory_space<vmem>>) attributes {dimension_semantics = [#tpu.dimension_semantics<parallel>], iteration_bounds = array<i64: 2>, scalar_prefetch = 0 : i64, scratch_operands = 0 : i64, tpu.core_type = #tpu.core_type<tc>, window_params = [{transform_indices = @transform_0, window_bounds = array<i64: 8, 128>}, {transform_indices = @transform_1, window_bounds = array<i64: 8, 128>}, {pipeline_mode = #tpu.pipeline_mode<synchronous>, transform_indices = @transform_2, window_bounds = array<i64: 128, 128>}, {pipeline_mode = #tpu.pipeline_mode<synchronous>, transform_indices = @transform_3, window_bounds = array<i64: 128, 128>}, {pipeline_mode = #tpu.pipeline_mode<synchronous>, transform_indices = @transform_4, window_bounds = array<i64: 1, 128>}, {pipeline_mode = #tpu.pipeline_mode<synchronous>, transform_indices = @transform_5, window_bounds = array<i64: 1, 128>}, {pipeline_mode = #tpu.pipeline_mode<synchronous>, transform_indices = @transform_6, window_bounds = array<i64: 1, 128>}, {transform_indices = @transform_7, window_bounds = array<i64: 8, 128>}]} {
    %c0 = arith.constant 0 : index
    %c0_0 = arith.constant 0 : index
    %0 = vector.load %arg1[%c0, %c0_0] : memref<8x128xf32, #tpu.memory_space<vmem>>, vector<8x128xf32>
    %c0_1 = arith.constant 0 : index
    %c0_2 = arith.constant 0 : index
    %1 = vector.load %arg3[%c0_1, %c0_2] : memref<128x128xf32, #tpu.memory_space<vmem>>, vector<128x128xf32>
    %cst = arith.constant dense<0.000000e+00> : vector<8x128xf32>
    %2 = tpu.matmul %0, %1, %cst {dimension_numbers = #tpu.dot_dimension_numbers<[1], [0], [0], [1], [0, 0, 1, 1], [], []>} : vector<8x128xf32>, vector<128x128xf32>, vector<8x128xf32> -> vector<8x128xf32>
    %c0_3 = arith.constant 0 : index
    %c0_4 = arith.constant 0 : index
    %3 = vector.load %arg2[%c0_3, %c0_4] : memref<8x128xf32, #tpu.memory_space<vmem>>, vector<8x128xf32>
    %c0_5 = arith.constant 0 : index
    %c0_6 = arith.constant 0 : index
    %4 = vector.load %arg4[%c0_5, %c0_6] : memref<128x128xf32, #tpu.memory_space<vmem>>, vector<128x128xf32>
    %cst_7 = arith.constant dense<0.000000e+00> : vector<8x128xf32>
    %5 = tpu.matmul %3, %4, %cst_7 {dimension_numbers = #tpu.dot_dimension_numbers<[1], [0], [0], [1], [0, 0, 1, 1], [], []>} : vector<8x128xf32>, vector<128x128xf32>, vector<8x128xf32> -> vector<8x128xf32>
    %6 = arith.addf %2, %5 : vector<8x128xf32>
    %c0_8 = arith.constant 0 : index
    %c0_9 = arith.constant 0 : index
    %7 = vector.load %arg5[%c0_8, %c0_9] : memref<1x128xf32, #tpu.memory_space<vmem>>, vector<1x128xf32>
    %8 = vector.broadcast %7 : vector<1x128xf32> to vector<8x128xf32>
    %9 = arith.addf %6, %8 : vector<8x128xf32>
    %cst_10 = arith.constant dense<0.000000e+00> : vector<8xf32>
    %10 = vector.multi_reduction <add>, %9, %cst_10 [1] : vector<8x128xf32> to vector<8xf32>
    %11 = vector.shape_cast %10 : vector<8xf32> to vector<8x1xf32>
    %12 = arith.mulf %9, %9 : vector<8x128xf32>
    %cst_11 = arith.constant dense<0.000000e+00> : vector<8xf32>
    %13 = vector.multi_reduction <add>, %12, %cst_11 [1] : vector<8x128xf32> to vector<8xf32>
    %14 = vector.shape_cast %13 : vector<8xf32> to vector<8x1xf32>
    %cst_12 = arith.constant 7.812500e-03 : f32
    %15 = vector.broadcast %cst_12 : f32 to vector<8x1xf32>
    %16 = arith.mulf %11, %15 : vector<8x1xf32>
    %cst_13 = arith.constant 7.812500e-03 : f32
    %17 = vector.broadcast %cst_13 : f32 to vector<8x1xf32>
    %18 = arith.mulf %14, %17 : vector<8x1xf32>
    %19 = arith.mulf %16, %16 : vector<8x1xf32>
    %20 = arith.subf %18, %19 : vector<8x1xf32>
    %cst_14 = arith.constant 0.000000e+00 : f32
    %21 = vector.broadcast %cst_14 : f32 to vector<8x1xf32>
    %22 = arith.maximumf %20, %21 : vector<8x1xf32>
    %cst_15 = arith.constant 9.99999974E-6 : f32
    %23 = vector.broadcast %cst_15 : f32 to vector<8x1xf32>
    %24 = arith.addf %22, %23 : vector<8x1xf32>
    %25 = math.rsqrt %24 : vector<8x1xf32>
    %26 = vector.broadcast %16 : vector<8x1xf32> to vector<8x128xf32>
    %27 = arith.subf %9, %26 : vector<8x128xf32>
    %28 = vector.broadcast %25 : vector<8x1xf32> to vector<8x128xf32>
    %29 = arith.mulf %27, %28 : vector<8x128xf32>
    %c0_16 = arith.constant 0 : index
    %c0_17 = arith.constant 0 : index
    %30 = vector.load %arg6[%c0_16, %c0_17] : memref<1x128xf32, #tpu.memory_space<vmem>>, vector<1x128xf32>
    %31 = vector.broadcast %30 : vector<1x128xf32> to vector<8x128xf32>
    %32 = arith.mulf %29, %31 : vector<8x128xf32>
    %c0_18 = arith.constant 0 : index
    %c0_19 = arith.constant 0 : index
    %33 = vector.load %arg7[%c0_18, %c0_19] : memref<1x128xf32, #tpu.memory_space<vmem>>, vector<1x128xf32>
    %34 = vector.broadcast %33 : vector<1x128xf32> to vector<8x128xf32>
    %35 = arith.addf %32, %34 : vector<8x128xf32>
    %cst_20 = arith.constant 0.000000e+00 : f32
    %36 = vector.broadcast %cst_20 : f32 to vector<8x128xf32>
    %37 = arith.maximumf %35, %36 : vector<8x128xf32>
    %c0_21 = arith.constant 0 : index
    %c0_22 = arith.constant 0 : index
    %38 = vector.load %arg8[%c0_21, %c0_22] : memref<8x128xf32, #tpu.memory_space<vmem>>, vector<8x128xf32>
    tpu.vector_store %arg8[%c0_21, %c0_22], %37 {strides = array<i32>} : memref<8x128xf32, #tpu.memory_space<vmem>>, vector<8x128xf32>,
    return
  }
  func.func @transform_0(%arg0: i32) -> (i32, i32) {
    %c0_i32 = arith.constant 0 : i32
    %c0_i32_0 = arith.constant 0 : i32
    return %arg0, %c0_i32 : i32, i32
  }
  func.func @transform_1(%arg0: i32) -> (i32, i32) {
    %c0_i32 = arith.constant 0 : i32
    %c0_i32_0 = arith.constant 0 : i32
    return %arg0, %c0_i32 : i32, i32
  }
  func.func @transform_2(%arg0: i32) -> (i32, i32) {
    %c0_i32 = arith.constant 0 : i32
    %c0_i32_0 = arith.constant 0 : i32
    %c0_i32_1 = arith.constant 0 : i32
    return %c0_i32, %c0_i32_0 : i32, i32
  }
  func.func @transform_3(%arg0: i32) -> (i32, i32) {
    %c0_i32 = arith.constant 0 : i32
    %c0_i32_0 = arith.constant 0 : i32
    %c0_i32_1 = arith.constant 0 : i32
    return %c0_i32, %c0_i32_0 : i32, i32
  }
  func.func @transform_4(%arg0: i32) -> (i32, i32) {
    %c0_i32 = arith.constant 0 : i32
    %c0_i32_0 = arith.constant 0 : i32
    %c0_i32_1 = arith.constant 0 : i32
    return %c0_i32, %c0_i32_0 : i32, i32
  }
  func.func @transform_5(%arg0: i32) -> (i32, i32) {
    %c0_i32 = arith.constant 0 : i32
    %c0_i32_0 = arith.constant 0 : i32
    %c0_i32_1 = arith.constant 0 : i32
    return %c0_i32, %c0_i32_0 : i32, i32
  }
  func.func @transform_6(%arg0: i32) -> (i32, i32) {
    %c0_i32 = arith.constant 0 : i32
    %c0_i32_0 = arith.constant 0 : i32
    %c0_i32_1 = arith.constant 0 : i32
    return %c0_i32, %c0_i32_0 : i32, i32
  }
  func.func @transform_7(%arg0: i32) -> (i32, i32) {
    %c0_i32 = arith.constant 0 : i32
    %c0_i32_0 = arith.constant 0 : i32
    return %arg0, %c0_i32 : i32, i32
  }
}

</mosaic_0001>

<bundles_post_ra>
// kernel: tpu_custom_call.1
= control target key start
LH: loop header
LB: loop body
LE: loop exit
PB: predicated region body
PF: predicated region fallthrough
CT: control target
= control target key end

     0   :  { %s1146_s0 = inlined_call_operand.hbm [shape: f32[16,128], index: 0, kind: input, shape index: {}]   ;;  %s1147_s1 = inlined_call_operand.hbm [shape: f32[16,128], index: 1, kind: input, shape index: {}]   ;;  %s1148_s2 = inlined_call_operand.hbm [shape: f32[128,128], index: 2, kind: input, shape index: {}]   ;;  %s1149_s3 = inlined_call_operand.hbm [shape: f32[128,128], index: 3, kind: input, shape index: {}]   ;;  %s1150_s4 = inlined_call_operand.vmem [shape: f32[1,128], index: 4, kind: input, shape index: {}]   ;;  %s1151_s5 = inlined_call_operand.vmem [shape: f32[1,128], index: 5, kind: input, shape index: {}]   ;;  %s1152_s6 = inlined_call_operand.vmem [shape: f32[1,128], index: 6, kind: input, shape index: {}]   ;;  %s1153_s7 = inlined_call_operand.hbm [shape: f32[16,128], index: 7, kind: output, shape index: {}]  }
   0x1   :  { %1158 = sst [smem:[#allocation20_spill]] %s1148_s2 }
   0x2   :  { %1159 = sst [smem:[#allocation21_spill]] %s1149_s3 }
   0x3   :  { %12 = vsyncpa [#allocation3], 0 }
   0x4   :  { %14 = vsyncpa [#allocation3 + $0x1], 0 }
   0x5   :  { %15 = vsyncpa [#allocation6], 0 }
   0x6   :  { %17 = vsyncpa [#allocation6 + $0x1], 0 }
   0x7   :  { %18 = vsyncpa [#allocation9], 0 }
   0x8   :  { %19 = vsyncpa [#allocation4], 0 }
   0x9   :  { %21 = vsyncpa [#allocation4 + $0x1], 0  ;;  %s952_s24 = smov 0   ;;  %s954_s25 = smov 0  }
   0xa   :  { %s956_s26 = smov 0   ;;  %s958_s27 = smov 0  }
   0xb LB: > { %1160 = sst [smem:[#allocation16_spill]] %s902_s26  ;;  %s976_s8 = sadd.s32 4294967295, %s906_s27   ;;  %s906_s27 = sphi %s958_s27, %s1174_s27   ;;  %s902_s26 = sphi %s956_s26, %s1176_s26   ;;  %s898_s25 = sphi %s954_s25, %s1178_s25   ;;  %s894_s24 = sphi %s952_s24, %s1177_s24  }
   0xc   : > { %1161 = sst [smem:[#allocation17_spill]] %s906_s27  ;;  %p611_p0 = scmp.ge.s32.totalorder %s906_s27, 1 }
   0xd   : > { %s1162_s2 = sld [smem:[#allocation20_spill]]  ;;  %p48_p1 = scmp.eq.s32.totalorder %s976_s8, 0 }
   0xe   : > { %p215_p2 = scmp.lt.s32.totalorder %s906_s27, 3  ;;  %s908_s10 = smov [#allocation7]  }
   0xf   : > { %s228_s11 = sshll.u32 %s908_s10, 4  ;;  %s1164_s3 = sld [smem:[#allocation21_spill]]  ;;  %s229_s11 = int_to_ptr.vmem [resolvable:$true] %s228_s11 }
  0x10   : > { %p981_p3 = pnand %p611_p0, %p215_p2  ;;  %s909_s15 = smov [#allocation8]  }
  0x11   : > { %s242_s16 = sshll.u32 %s909_s15, 4  ;;  %s910_s17 = smov 128   ;;  %s243_s16 = int_to_ptr.vmem [resolvable:$true] %s242_s16 }
  0x12   : > { %p643_p4 = pneg %p981_p3  ;;  %s911_s18 = smov 8  }
  0x13   : > { %s226_s30 = sshll.u32 %s1162_s2, 4  ;;  %s610_s19 = sadd.s32 4294967294, %s906_s27   ;;  %s227_s30 = int_to_ptr.hbm [resolvable:$true] %s226_s30 }
  0x14   : > { %p644_p6 = pnand %p643_p4, %p48_p1  ;;  %s995_s20 = sadd.s32 1, %s906_s27  }
  0x15   : > { %s240_s14 = sshll.u32 %s1164_s3, 4  ;;  %1165 = sst [smem:[#allocation18_spill]] %s995_s20  ;;  %s241_s14 = int_to_ptr.hbm [resolvable:$true] %s240_s14 }
  0x16   : > { %646 = dma.hbm_to_vmem [thread:$0]  (!%p644_p6), %s227_s30, 2048, %s229_s11, [#allocation6], %s910_s17, %s910_s17, %s911_s18  }
  0x17   : > { %649 = dma.hbm_to_vmem [thread:$0]  (!%p644_p6), %s241_s14, 2048, %s243_s16, [#allocation9], %s910_s17, %s910_s17, %s911_s18  }
  0x18   : > { %s31_s21 = ssub.s32 %s906_s27, %s995_s20  ;;  %s34_s22 = sadd.s32 1, %s902_s26 }
  0x19   : > { %p32_p7 = scmp.eq.s32.totalorder %s31_s21, 0  ;;  %p41_p8 = scmp.ne.s32.totalorder %s902_s26, %s898_s25 }
  0x1a   : > { %p42_p9 = scmp.eq.s32.totalorder %s906_s27, 0  ;;  %p47_p10 = scmp.ne.s32.totalorder %s898_s25, %s894_s24 }
  0x1b   : > { %s1006_s23 = scalar_select %p32_p7, %s902_s26, %s34_s22  }
  0x1c   : > { %p1008_p11 = por %p42_p9, %p41_p8  ;;  %p1014_p12 = por %p48_p1, %p47_p10 }
  0x1d   : > { %1166 = sst [smem:[#allocation19_spill]] %s1006_s23  ;;  %p202_p13 = scmp.eq.s32.totalorder %s976_s8, 1 }
  0x1e   : > { %p208_p0 = scmp.eq.s32.totalorder %s610_s19, 1  ;;  %p663_p2 = scmp.lt.s32.totalorder %s906_s27, 2 }
  0x1f   : > { %s265_s30 = sand.u32 1, %s902_s26   ;;  %p1021_p4 = por %p202_p13, %p41_p8 }
  0x20   : > { %p1025_p6 = por %p208_p0, %p47_p10  ;;  %s1029_s12 = sshll.u32 %s265_s30, 3 }
  0x21   : > { %s616_s13 = sshll.u32 %s906_s27, 3  ;;  %s269_s17 = scalar_lea.vmem [#allocation2], %s1029_s12 }
  0x22   : > { %s273_s16 = scalar_lea.hbm %s1146_s0, %s616_s13  ;;  %s277_s18 = sshll.u32 %s269_s17, 4  ;;  %s278_s18 = int_to_ptr.vmem [resolvable:$true] %s277_s18 }
  0x23   : > { %s275_s19 = sshll.u32 %s273_s16, 4  ;;  %p1038_p7 = pnand %p663_p2, %p1008_p11  ;;  %s276_s19 = int_to_ptr.hbm [resolvable:$true] %s275_s19 }
  0x24   : > { %s292_s3 = scalar_lea.hbm %s1147_s1, %s616_s13  ;;  %s284_s23 = sand.u32 1, %s906_s27  }
  0x25   : > { %s266_s26 = scalar_lea.sflag [#allocation3], %s265_s30  ;;  %s768_s14 = sshra.s32 %s276_s19, 4  ;;  %s769_s14 = int_to_ptr.hbm [resolvable:$true] %s768_s14 }
  0x26   : > { %s770_s15 = scalar_lea.hbm %s769_s14, 8  ;;  %p772_p9 = pneg %p1038_p7 }
  0x27   : > { %p771_p8 = scmp.ne.s32.totalorder %s769_s14, %s770_s15  ;;  %s775_s17 = scalar_lea.hbm %s1146_s0, 16 }
  0x28   : > { %p776_p13 = scmp.lt.s32.totalorder %s769_s14, %s1146_s0  ;;  %p777_p0 = scmp.lt.s32.totalorder %s775_s17, %s770_s15 }
  0x29   : > { %p773_p10 = pnand %p772_p9, %p771_p8 }
  0x2a   : > { %p778_p2 = por %p777_p0, %p776_p13 }
  0x2b   : > { %p774_p11 = pneg %p773_p10 }
  0x2d   : > { %p779_p5 = pnand %p778_p2, %p774_p11 }
  0x2f   : > { %782 = shalt.err (!%p779_p5)
}
  0x30   : > { %653 = dma.hbm_to_vmem [thread:$0]  (!%p1038_p7), %s276_s19, 128, %s278_s18, %s266_s26  }
  0x31   : > { %s294_s30 = sshll.u32 %s292_s3, 4  ;;  %s288_s13 = scalar_lea.vmem [#allocation5], %s1029_s12  ;;  %s295_s30 = int_to_ptr.hbm [resolvable:$true] %s294_s30 }
  0x32   : > { %s296_s20 = sshll.u32 %s288_s13, 4  ;;  %s285_s28 = scalar_lea.sflag [#allocation6], %s284_s23  ;;  %s297_s20 = int_to_ptr.vmem [resolvable:$true] %s296_s20 }
  0x33   : > { %s798_s16 = sshra.s32 %s295_s30, 4  ;;  %s805_s17 = scalar_lea.hbm %s1147_s1, 16  ;;  %s799_s16 = int_to_ptr.hbm [resolvable:$true] %s798_s16 }
  0x34   : > { %s800_s27 = scalar_lea.hbm %s799_s16, 8  ;;  %p806_p5 = scmp.lt.s32.totalorder %s799_s16, %s1147_s1 }
  0x35   : > { %p801_p8 = scmp.ne.s32.totalorder %s799_s16, %s800_s27  ;;  %p807_p13 = scmp.lt.s32.totalorder %s805_s17, %s800_s27 }
  0x37   : > { %p803_p10 = pnand %p801_p8, %p772_p9  ;;  %p808_p0 = por %p807_p13, %p806_p5 }
  0x39   : > { %p804_p11 = pneg %p803_p10 }
  0x3b   : > { %p809_p2 = pnand %p808_p0, %p804_p11 }
  0x3d   : > { %812 = shalt.err (!%p809_p2)
}
  0x3e   : > { %656 = dma.hbm_to_vmem [thread:$0]  (!%p1038_p7), %s295_s30, 128, %s297_s20, %s285_s28  }
  0x3f   : > { %305 = sbr.rel (%p981_p3) target bundleno = 400 (0x190), region = 48  ;;  %s1074_s3 = sand.u32 (!%p981_p3), 1, %s898_s25  }
  0x40   : > { %s1077_s23 = sshll.u32 (!%p981_p3), %s1074_s3, 3  ;;  %s308_s12 = scalar_lea.sflag (!%p981_p3), [#allocation3], %s1074_s3 }
  0x41   : > { %s311_s27 = scalar_lea.vmem (!%p981_p3), [#allocation2], %s1077_s23 }
  0x44   : > { %873 = dma.done.wait (%p1014_p12), %s308_s12, 128  }
  0x45   : > { %875 = vsyncadd (%p1014_p12), %s308_s12, 4294967168  ;;  %s317_s9 = sand.u32 1, %s976_s8   ;;  %s321_s18 = scalar_lea.vmem [#allocation5], %s1077_s23 }
  0x46   : > { %s318_s20 = scalar_lea.sflag [#allocation6], %s317_s9 }
  0x47   : > { %877 = dma.done.wait (%p1014_p12), %s318_s20, 128  }
  0x48   : > { %879 = vsyncadd (%p1014_p12), %s318_s20, 4294967168 }
  0x49   : > { %881 = dma.done.wait (%p48_p1), [#allocation6], 2048  }
  0x4a   : > { %883 = vsyncadd (%p48_p1), [#allocation6], 4294965248 }
  0x4b   : > { %885 = dma.done.wait (%p48_p1), [#allocation9], 2048  }
  0x4c   : > { %887 = vsyncadd (%p48_p1), [#allocation9], 4294965248  ;;  %v401_v0 = vld [vmem:[#allocation8 + $0x78] sm:$0xff]  ;;  %v400_v2 = vld [vmem:[#allocation8 + $0x70] sm:$0xff]  ;;  %s626_s21 = sshll.u32 %s976_s8, 3  ;;  %s367_s8 = scalar_lea.vmem [#allocation10], %s1077_s23 }
  0x4d   : > { %v384_v1 = vld [vmem:[#allocation7 + $0x78] sm:$0xff]  ;;  %402 = vmatpush.msra.mxu0 %v401_v0  ;;  %v383_v3 = vld [vmem:[#allocation7 + $0x70] sm:$0xff]  ;;  %v399_v4 = vld [vmem:[#allocation8 + $0x68] sm:$0xff]  ;;  %s493_s15 = scalar_lea.hbm %s1153_s7, %s626_s21  ;;  %s495_s17 = sshll.u32 %s367_s8, 4  ;;  %s496_s17 = int_to_ptr.vmem [resolvable:$true] %s495_s17 }
  0x4e   : > { %422 = vmatpush.msra.mxu1 %v384_v1  ;;  %v382_v5 = vld [vmem:[#allocation7 + $0x68] sm:$0xff]  ;;  %v398_v6 = vld [vmem:[#allocation8 + $0x60] sm:$0xff]  ;;  %v397_v8 = vld [vmem:[#allocation8 + $0x58] sm:$0xff]  ;;  %s497_s2 = sshll.u32 %s493_s15, 4  ;;  %s483_s26 = scalar_lea.sflag [#allocation4], %s1074_s3  ;;  %s498_s2 = int_to_ptr.hbm [resolvable:$true] %s497_s2 }
  0x4f   : > { %403 = vmatpush.msra.mxu0 %v400_v2  ;;  %v381_v7 = vld [vmem:[#allocation7 + $0x60] sm:$0xff]  ;;  %v380_v9 = vld [vmem:[#allocation7 + $0x58] sm:$0xff]  ;;  %v396_v10 = vld [vmem:[#allocation8 + $0x50] sm:$0xff]  ;;  %s842_s12 = sshra.s32 %s498_s2, 4  ;;  %s843_s12 = int_to_ptr.hbm [resolvable:$true] %s842_s12 }
  0x50   : > { %423 = vmatpush.msra.mxu1 %v383_v3  ;;  %v379_v11 = vld [vmem:[#allocation7 + $0x50] sm:$0xff]  ;;  %v395_v12 = vld [vmem:[#allocation8 + $0x48] sm:$0xff]  ;;  %v394_v14 = vld [vmem:[#allocation8 + $0x40] sm:$0xff]  ;;  %p849_p7 = scmp.lt.s32.totalorder %s843_s12, %s1153_s7 }
  0x51   : > { %404 = vmatpush.msra.mxu0 %v399_v4  ;;  %v378_v13 = vld [vmem:[#allocation7 + $0x48] sm:$0xff]  ;;  %v377_v15 = vld [vmem:[#allocation7 + $0x40] sm:$0xff]  ;;  %v393_v16 = vld [vmem:[#allocation8 + $0x38] sm:$0xff] }
  0x52   : > { %424 = vmatpush.msra.mxu1 %v382_v5  ;;  %v376_v17 = vld [vmem:[#allocation7 + $0x38] sm:$0xff]  ;;  %v392_v18 = vld [vmem:[#allocation8 + $0x30] sm:$0xff]  ;;  %v391_v20 = vld [vmem:[#allocation8 + $0x28] sm:$0xff] }
  0x53   : > { %405 = vmatpush.msra.mxu0 %v398_v6  ;;  %v375_v19 = vld [vmem:[#allocation7 + $0x30] sm:$0xff]  ;;  %v374_v21 = vld [vmem:[#allocation7 + $0x28] sm:$0xff]  ;;  %v390_v22 = vld [vmem:[#allocation8 + $0x20] sm:$0xff] }
  0x54   : > { %425 = vmatpush.msra.mxu1 %v381_v7  ;;  %v373_v23 = vld [vmem:[#allocation7 + $0x20] sm:$0xff]  ;;  %v389_v24 = vld [vmem:[#allocation8 + $0x18] sm:$0xff]  ;;  %v388_v26 = vld [vmem:[#allocation8 + $0x10] sm:$0xff] }
  0x55   : > { %406 = vmatpush.msra.mxu0 %v397_v8  ;;  %v372_v25 = vld [vmem:[#allocation7 + $0x18] sm:$0xff]  ;;  %v371_v27 = vld [vmem:[#allocation7 + $0x10] sm:$0xff]  ;;  %v387_v28 = vld [vmem:[#allocation8 + $0x8] sm:$0xff] }
  0x56   : > { %426 = vmatpush.msra.mxu1 %v380_v9  ;;  %v370_v29 = vld [vmem:[#allocation7 + $0x8] sm:$0xff]  ;;  %v386_v30 = vld [vmem:[#allocation8] sm:$0xff]  ;;  %v385_v32 = vld [vmem:[%s321_s18] sm:$0xff]  ;;  %s848_s18 = scalar_lea.hbm %s1153_s7, 16 }
  0x57   : > { %407 = vmatpush.msra.mxu0 %v396_v10  ;;  %v369_v31 = vld [vmem:[#allocation7] sm:$0xff] }
  0x58   : > { %427 = vmatpush.msra.mxu1 %v379_v11  ;;  %v368_v33 = vld [vmem:[%s311_s27] sm:$0xff]  ;;  %s844_s27 = scalar_lea.hbm %s843_s12, 8 }
  0x59   : > { %408 = vmatpush.msra.mxu0 %v395_v12  ;;  %v703_v34 = vld [vmem:[%s1150_s4] ss:$0 sm:$0xff]  ;;  %p845_p1 = scmp.ne.s32.totalorder %s843_s12, %s844_s27  ;;  %p850_p9 = scmp.lt.s32.totalorder %s848_s18, %s844_s27 }
  0x5a   : > { %428 = vmatpush.msra.mxu1 %v378_v13  ;;  %v704_v55 = vld [vmem:[%s1151_s5] ss:$0 sm:$0xff] }
  0x5b   : > { %409 = vmatpush.msra.mxu0 %v394_v14  ;;  %v705_v58 = vld [vmem:[%s1152_s6] ss:$0 sm:$0xff]  ;;  %p846_p3 = pnand %p845_p1, %p1021_p4  ;;  %p851_p8 = por %p850_p9, %p849_p7 }
  0x5c   : > { %429 = vmatpush.msra.mxu1 %v377_v15 }
  0x5d   : > { %410 = vmatpush.msra.mxu0 %v393_v16  ;;  %p847_p12 = pneg %p846_p3 }
  0x5e   : > { %430 = vmatpush.msra.mxu1 %v376_v17 }
  0x5f   : > { %411 = vmatpush.msra.mxu0 %v392_v18  ;;  %p852_p10 = pnand %p851_p8, %p847_p12 }
  0x60   : > { %431 = vmatpush.msra.mxu1 %v375_v19 }
  0x61   : > { %412 = vmatpush.msra.mxu0 %v391_v20 }
  0x62   : > { %432 = vmatpush.msra.mxu1 %v374_v21 }
  0x63   : > { %413 = vmatpush.msra.mxu0 %v390_v22 }
  0x64   : > { %433 = vmatpush.msra.mxu1 %v373_v23 }
  0x65   : > { %414 = vmatpush.msra.mxu0 %v389_v24 }
  0x66   : > { %434 = vmatpush.msra.mxu1 %v372_v25 }
  0x67   : > { %415 = vmatpush.msra.mxu0 %v388_v26 }
  0x68   : > { %435 = vmatpush.msra.mxu1 %v371_v27 }
  0x69   : > { %416 = vmatpush.msra.mxu0 %v387_v28 }
  0x6a   : > { %436 = vmatpush.msra.mxu1 %v370_v29 }
  0x6b   : > { %417 = vmatpush.msra.mxu0 %v386_v30 }
  0x6c   : > { %437 = vmatpush.msra.mxu1 %v369_v31  ;;  %418 = vmatmul.f32.vlgmr.msra.gmra.mxu0 %v385_v32 }
  0x6d   : > { %438 = vmatmul.f32.vlgmr.msra.gmra.mxu1 %v368_v33 }
  0xe9   : > { %v419_v35 = vpop.f32.mrf.mxu0 }
  0xea   : > { %v439_v36 = vpop.f32.mrf.mxu1 }
  0xeb   : > { %v440_v37 = vadd.f32 %v439_v36, %v419_v35 }
  0xed   : > { %v446_v38 = vadd.f32 %v703_v34, %v440_v37 }
  0xef   : > { %447 = vadd.xlane.f32.xlu0 %v446_v38  ;;  %v449_v39 = vmul.f32 %v446_v38, %v446_v38 }
  0xf7   : > { %450 = vadd.xlane.f32.xlu0 %v449_v39 }
 0x162   : > { %v448_v40 = vpop.xlane.xlu0 %447 }
 0x163   : > { %v452_v41 = vmul.f32 0.0078125, %v448_v40 }
 0x165   : > { %v454_v43 = vmul.f32 %v452_v41, %v452_v41  ;;  %v468_v54 = vsub.f32 %v446_v38, %v452_v41 }
 0x16a   : > { %v451_v42 = vpop.xlane.xlu0 %450 }
 0x16b   : > { %v453_v44 = vmul.f32 0.0078125, %v451_v42 }
 0x16d   : > { %v455_v45 = vsub.f32 %v453_v44, %v454_v43 }
 0x16f   : > { %v456_v46 = vmax.f32 %v455_v45, 0.0 }
 0x171   : > { %v457_v47 = vadd.f32 1e-05, %v456_v46 }
 0x173   : > { %706 = vrsqrt.f32 %v457_v47  ;;  %vm464_vm1 = vweird.f32 %v457_v47 }
 0x179   : > { %v707_v48 = vpop.eup %706 }
 0x17a   : > { %v459_v49 = vmul.f32 %v707_v48, %v457_v47  ;;  %vm465_vm0 = vweird.f32 %v707_v48 }
 0x17b   : > { %vm466_vm2 = vmor %vm464_vm1, %vm465_vm0 }
 0x17c   : > { %v460_v50 = vmul.f32 %v707_v48, %v459_v49 }
 0x17e   : > { %v461_v51 = vmul.f32 0.5, %v460_v50 }
 0x180   : > { %v462_v52 = vsub.f32 1.5, %v461_v51 }
 0x182   : > { %v463_v53 = vmul.f32 %v707_v48, %v462_v52 }
 0x184   : > { %v467_v56 = vsel %vm466_vm2, %v707_v48, %v463_v53 }
 0x185   : > { %v469_v57 = vmul.f32 %v468_v54, %v467_v56 }
 0x187   : > { %v474_v59 = vmul.f32 %v704_v55, %v469_v57 }
 0x189   : > { %v479_v60 = vadd.f32 %v705_v58, %v474_v59 }
 0x18b   : > { %v480_v61 = vmax.f32 %v479_v60, 0.0 }
 0x18d   : > { %481 = vst [vmem:[%s367_s8] sm:$0xff] %v480_v61 }
 0x18e   : > { %855 = shalt.err (!%p852_p10)
}
 0x18f   : > { %641 = dma.vmem_to_hbm [thread:$0]  (%p1021_p4), %s496_s17, 128, %s498_s2, %s483_s26  }
 0x190 PF: > { %s1172_s3 = sld [smem:[#allocation17_spill]]  ;;  %s509_s19 = sand.u32 1, %s894_s24  }
 0x191   : > { %s510_s21 = scalar_lea.sflag [#allocation4], %s509_s19 }
 0x196   : > { %p1173_p11 = scmp.ge.s32.totalorder %s1172_s3, 2 }
 0x198   : > { %p658_p5 = pnand %p1173_p11, %p1025_p6 }
 0x19a   : > { %p659_p13 = pneg %p658_p5 }
 0x19c   : > { %889 = dma.done.wait (%p659_p13), %s510_s21, 128  }
 0x19d   : > { %891 = vsyncadd (%p659_p13), %s510_s21, 4294967168  ;;  %s1174_s27 = sld [smem:[#allocation18_spill]]  ;;  %s1177_s24 = smov %s898_s25 }
 0x19e   : > { %s1175_s22 = sld [smem:[#allocation16_spill]] }
 0x19f   : > { %s1176_s26 = sld [smem:[#allocation19_spill]] }
 0x1a3   : > { %p24_p0 = scmp.ge.s32.totalorder %s1174_s27, 4  }
 0x1a4   : > { %s1178_s25 = smov %s1175_s22 }
 0x1a5   :  { %26 = sbr.rel (!%p24_p0) target bundleno = 11 (0xb), region = 114 }
 0x1aa   :  { %516 = vsyncpa [#allocation3], 1 }
 0x1ab   :  { %518 = vsyncpa [#allocation3 + $0x1], 1 }
 0x1ac   :  { %519 = vsyncpa [#allocation6], 1 }
 0x1ad   :  { %521 = vsyncpa [#allocation6 + $0x1], 1 }
 0x1ae   :  { %522 = vsyncpa [#allocation9], 1 }
 0x1af   :  { %523 = vsyncpa [#allocation4], 1 }
 0x1b0   :  { %525 = vsyncpa [#allocation4 + $0x1], 1 }

// kernel: tpu_custom_call.1
= control target key start
LH: loop header
LB: loop body
LE: loop exit
PB: predicated region body
PF: predicated region fallthrough
CT: control target
= control target key end

     0   :  { %s1146_s0 = inlined_call_operand.hbm [shape: f32[16,128], index: 0, kind: input, shape index: {}]   ;;  %s1147_s1 = inlined_call_operand.hbm [shape: f32[16,128], index: 1, kind: input, shape index: {}]   ;;  %s1148_s2 = inlined_call_operand.hbm [shape: f32[128,128], index: 2, kind: input, shape index: {}]   ;;  %s1149_s3 = inlined_call_operand.hbm [shape: f32[128,128], index: 3, kind: input, shape index: {}]   ;;  %s1150_s4 = inlined_call_operand.vmem [shape: f32[1,128], index: 4, kind: input, shape index: {}]   ;;  %s1151_s5 = inlined_call_operand.vmem [shape: f32[1,128], index: 5, kind: input, shape index: {}]   ;;  %s1152_s6 = inlined_call_operand.vmem [shape: f32[1,128], index: 6, kind: input, shape index: {}]   ;;  %s1153_s7 = inlined_call_operand.hbm [shape: f32[16,128], index: 7, kind: output, shape index: {}]  }
   0x1   :  { %1158 = sst [smem:[#allocation20_spill]] %s1148_s2 }
   0x2   :  { %1159 = sst [smem:[#allocation21_spill]] %s1149_s3 }
   0x3   :  { %12 = vsyncpa [#allocation3], 0 }
   0x4   :  { %14 = vsyncpa [#allocation3 + $0x1], 0 }
   0x5   :  { %15 = vsyncpa [#allocation6], 0 }
   0x6   :  { %17 = vsyncpa [#allocation6 + $0x1], 0 }
   0x7   :  { %18 = vsyncpa [#allocation9], 0 }
   0x8   :  { %19 = vsyncpa [#allocation4], 0 }
   0x9   :  { %21 = vsyncpa [#allocation4 + $0x1], 0  ;;  %s952_s24 = smov 0   ;;  %s954_s25 = smov 0  }
   0xa   :  { %s956_s26 = smov 0   ;;  %s958_s27 = smov 0  }
   0xb LB: > { %1160 = sst [smem:[#allocation16_spill]] %s902_s26  ;;  %s976_s8 = sadd.s32 4294967295, %s906_s27   ;;  %s906_s27 = sphi %s958_s27, %s1174_s27   ;;  %s902_s26 = sphi %s956_s26, %s1176_s26   ;;  %s898_s25 = sphi %s954_s25, %s1178_s25   ;;  %s894_s24 = sphi %s952_s24, %s1177_s24  }
   0xc   : > { %1161 = sst [smem:[#allocation17_spill]] %s906_s27  ;;  %p611_p0 = scmp.ge.s32.totalorder %s906_s27, 1 }
   0xd   : > { %s1162_s2 = sld [smem:[#allocation20_spill]]  ;;  %p48_p1 = scmp.eq.s32.totalorder %s976_s8, 0 }
   0xe   : > { %p215_p2 = scmp.lt.s32.totalorder %s906_s27, 3  ;;  %s908_s10 = smov [#allocation7]  }
   0xf   : > { %s228_s11 = sshll.u32 %s908_s10, 4  ;;  %s1164_s3 = sld [smem:[#allocation21_spill]]  ;;  %s229_s11 = int_to_ptr.vmem [resolvable:$true] %s228_s11 }
  0x10   : > { %p981_p3 = pnand %p611_p0, %p215_p2  ;;  %s909_s15 = smov [#allocation8]  }
  0x11   : > { %s242_s16 = sshll.u32 %s909_s15, 4  ;;  %s910_s17 = smov 128   ;;  %s243_s16 = int_to_ptr.vmem [resolvable:$true] %s242_s16 }
  0x12   : > { %p643_p4 = pneg %p981_p3  ;;  %s911_s18 = smov 8  }
  0x13   : > { %s226_s30 = sshll.u32 %s1162_s2, 4  ;;  %s610_s19 = sadd.s32 4294967294, %s906_s27   ;;  %s227_s30 = int_to_ptr.hbm [resolvable:$true] %s226_s30 }
  0x14   : > { %p644_p6 = pnand %p643_p4, %p48_p1  ;;  %s995_s20 = sadd.s32 1, %s906_s27  }
  0x15   : > { %s240_s14 = sshll.u32 %s1164_s3, 4  ;;  %1165 = sst [smem:[#allocation18_spill]] %s995_s20  ;;  %s241_s14 = int_to_ptr.hbm [resolvable:$true] %s240_s14 }
  0x16   : > { %646 = dma.hbm_to_vmem [thread:$0]  (!%p644_p6), %s227_s30, 2048, %s229_s11, [#allocation6], %s910_s17, %s910_s17, %s911_s18  }
  0x17   : > { %649 = dma.hbm_to_vmem [thread:$0]  (!%p644_p6), %s241_s14, 2048, %s243_s16, [#allocation9], %s910_s17, %s910_s17, %s911_s18  }
  0x18   : > { %s31_s21 = ssub.s32 %s906_s27, %s995_s20  ;;  %s34_s22 = sadd.s32 1, %s902_s26 }
  0x19   : > { %p32_p7 = scmp.eq.s32.totalorder %s31_s21, 0  ;;  %p41_p8 = scmp.ne.s32.totalorder %s902_s26, %s898_s25 }
  0x1a   : > { %p42_p9 = scmp.eq.s32.totalorder %s906_s27, 0  ;;  %p47_p10 = scmp.ne.s32.totalorder %s898_s25, %s894_s24 }
  0x1b   : > { %s1006_s23 = scalar_select %p32_p7, %s902_s26, %s34_s22  }
  0x1c   : > { %p1008_p11 = por %p42_p9, %p41_p8  ;;  %p1014_p12 = por %p48_p1, %p47_p10 }
  0x1d   : > { %1166 = sst [smem:[#allocation19_spill]] %s1006_s23  ;;  %p202_p13 = scmp.eq.s32.totalorder %s976_s8, 1 }
  0x1e   : > { %p208_p0 = scmp.eq.s32.totalorder %s610_s19, 1  ;;  %p663_p2 = scmp.lt.s32.totalorder %s906_s27, 2 }
  0x1f   : > { %s265_s30 = sand.u32 1, %s902_s26   ;;  %p1021_p4 = por %p202_p13, %p41_p8 }
  0x20   : > { %p1025_p6 = por %p208_p0, %p47_p10  ;;  %s1029_s12 = sshll.u32 %s265_s30, 3 }
  0x21   : > { %s616_s13 = sshll.u32 %s906_s27, 3  ;;  %s269_s17 = scalar_lea.vmem [#allocation2], %s1029_s12 }
  0x22   : > { %s273_s16 = scalar_lea.hbm %s1146_s0, %s616_s13  ;;  %s277_s18 = sshll.u32 %s269_s17, 4  ;;  %s278_s18 = int_to_ptr.vmem [resolvable:$true] %s277_s18 }
  0x23   : > { %s275_s19 = sshll.u32 %s273_s16, 4  ;;  %p1038_p7 = pnand %p663_p2, %p1008_p11  ;;  %s276_s19 = int_to_ptr.hbm [resolvable:$true] %s275_s19 }
  0x24   : > { %s292_s3 = scalar_lea.hbm %s1147_s1, %s616_s13  ;;  %s284_s23 = sand.u32 1, %s906_s27  }
  0x25   : > { %s266_s26 = scalar_lea.sflag [#allocation3], %s265_s30  ;;  %s768_s14 = sshra.s32 %s276_s19, 4  ;;  %s769_s14 = int_to_ptr.hbm [resolvable:$true] %s768_s14 }
  0x26   : > { %s770_s15 = scalar_lea.hbm %s769_s14, 8  ;;  %p772_p9 = pneg %p1038_p7 }
  0x27   : > { %p771_p8 = scmp.ne.s32.totalorder %s769_s14, %s770_s15  ;;  %s775_s17 = scalar_lea.hbm %s1146_s0, 16 }
  0x28   : > { %p776_p13 = scmp.lt.s32.totalorder %s769_s14, %s1146_s0  ;;  %p777_p0 = scmp.lt.s32.totalorder %s775_s17, %s770_s15 }
  0x29   : > { %p773_p10 = pnand %p772_p9, %p771_p8 }
  0x2a   : > { %p778_p2 = por %p777_p0, %p776_p13 }
  0x2b   : > { %p774_p11 = pneg %p773_p10 }
  0x2d   : > { %p779_p5 = pnand %p778_p2, %p774_p11 }
  0x2f   : > { %782 = shalt.err (!%p779_p5)
}
  0x30   : > { %653 = dma.hbm_to_vmem [thread:$0]  (!%p1038_p7), %s276_s19, 128, %s278_s18, %s266_s26  }
  0x31   : > { %s294_s30 = sshll.u32 %s292_s3, 4  ;;  %s288_s13 = scalar_lea.vmem [#allocation5], %s1029_s12  ;;  %s295_s30 = int_to_ptr.hbm [resolvable:$true] %s294_s30 }
  0x32   : > { %s296_s20 = sshll.u32 %s288_s13, 4  ;;  %s285_s28 = scalar_lea.sflag [#allocation6], %s284_s23  ;;  %s297_s20 = int_to_ptr.vmem [resolvable:$true] %s296_s20 }
  0x33   : > { %s798_s16 = sshra.s32 %s295_s30, 4  ;;  %s805_s17 = scalar_lea.hbm %s1147_s1, 16  ;;  %s799_s16 = int_to_ptr.hbm [resolvable:$true] %s798_s16 }
  0x34   : > { %s800_s27 = scalar_lea.hbm %s799_s16, 8  ;;  %p806_p5 = scmp.lt.s32.totalorder %s799_s16, %s1147_s1 }
  0x35   : > { %p801_p8 = scmp.ne.s32.totalorder %s799_s16, %s800_s27  ;;  %p807_p13 = scmp.lt.s32.totalorder %s805_s17, %s800_s27 }
  0x37   : > { %p803_p10 = pnand %p801_p8, %p772_p9  ;;  %p808_p0 = por %p807_p13, %p806_p5 }
  0x39   : > { %p804_p11 = pneg %p803_p10 }
  0x3b   : > { %p809_p2 = pnand %p808_p0, %p804_p11 }
  0x3d   : > { %812 = shalt.err (!%p809_p2)
}
  0x3e   : > { %656 = dma.hbm_to_vmem [thread:$0]  (!%p1038_p7), %s295_s30, 128, %s297_s20, %s285_s28  }
  0x3f   : > { %305 = sbr.rel (%p981_p3) target bundleno = 400 (0x190), region = 48  ;;  %s1074_s3 = sand.u32 (!%p981_p3), 1, %s898_s25  }
  0x40   : > { %s1077_s23 = sshll.u32 (!%p981_p3), %s1074_s3, 3  ;;  %s308_s12 = scalar_lea.sflag (!%p981_p3), [#allocation3], %s1074_s3 }
  0x41   : > { %s311_s27 = scalar_lea.vmem (!%p981_p3), [#allocation2], %s1077_s23 }
  0x44   : > { %873 = dma.done.wait (%p1014_p12), %s308_s12, 128  }
  0x45   : > { %875 = vsyncadd (%p1014_p12), %s308_s12, 4294967168  ;;  %s317_s9 = sand.u32 1, %s976_s8   ;;  %s321_s18 = scalar_lea.vmem [#allocation5], %s1077_s23 }
  0x46   : > { %s318_s20 = scalar_lea.sflag [#allocation6], %s317_s9 }
  0x47   : > { %877 = dma.done.wait (%p1014_p12), %s318_s20, 128  }
  0x48   : > { %879 = vsyncadd (%p1014_p12), %s318_s20, 4294967168 }
  0x49   : > { %881 = dma.done.wait (%p48_p1), [#allocation6], 2048  }
  0x4a   : > { %883 = vsyncadd (%p48_p1), [#allocation6], 4294965248 }
  0x4b   : > { %885 = dma.done.wait (%p48_p1), [#allocation9], 2048  }
  0x4c   : > { %887 = vsyncadd (%p48_p1), [#allocation9], 4294965248  ;;  %v401_v0 = vld [vmem:[#allocation8 + $0x78] sm:$0xff]  ;;  %v400_v2 = vld [vmem:[#allocation8 + $0x70] sm:$0xff]  ;;  %s626_s21 = sshll.u32 %s976_s8, 3  ;;  %s367_s8 = scalar_lea.vmem [#allocation10], %s1077_s23 }
  0x4d   : > { %v384_v1 = vld [vmem:[#allocation7 + $0x78] sm:$0xff]  ;;  %402 = vmatpush.msra.mxu0 %v401_v0  ;;  %v383_v3 = vld [vmem:[#allocation7 + $0x70] sm:$0xff]  ;;  %v399_v4 = vld [vmem:[#allocation8 + $0x68] sm:$0xff]  ;;  %s493_s15 = scalar_lea.hbm %s1153_s7, %s626_s21  ;;  %s495_s17 = sshll.u32 %s367_s8, 4  ;;  %s496_s17 = int_to_ptr.vmem [resolvable:$true] %s495_s17 }
  0x4e   : > { %422 = vmatpush.msra.mxu1 %v384_v1  ;;  %v382_v5 = vld [vmem:[#allocation7 + $0x68] sm:$0xff]  ;;  %v398_v6 = vld [vmem:[#allocation8 + $0x60] sm:$0xff]  ;;  %v397_v8 = vld [vmem:[#allocation8 + $0x58] sm:$0xff]  ;;  %s497_s2 = sshll.u32 %s493_s15, 4  ;;  %s483_s26 = scalar_lea.sflag [#allocation4], %s1074_s3  ;;  %s498_s2 = int_to_ptr.hbm [resolvable:$true] %s497_s2 }
  0x4f   : > { %403 = vmatpush.msra.mxu0 %v400_v2  ;;  %v381_v7 = vld [vmem:[#allocation7 + $0x60] sm:$0xff]  ;;  %v380_v9 = vld [vmem:[#allocation7 + $0x58] sm:$0xff]  ;;  %v396_v10 = vld [vmem:[#allocation8 + $0x50] sm:$0xff]  ;;  %s842_s12 = sshra.s32 %s498_s2, 4  ;;  %s843_s12 = int_to_ptr.hbm [resolvable:$true] %s842_s12 }
  0x50   : > { %423 = vmatpush.msra.mxu1 %v383_v3  ;;  %v379_v11 = vld [vmem:[#allocation7 + $0x50] sm:$0xff]  ;;  %v395_v12 = vld [vmem:[#allocation8 + $0x48] sm:$0xff]  ;;  %v394_v14 = vld [vmem:[#allocation8 + $0x40] sm:$0xff]  ;;  %p849_p7 = scmp.lt.s32.totalorder %s843_s12, %s1153_s7 }
  0x51   : > { %404 = vmatpush.msra.mxu0 %v399_v4  ;;  %v378_v13 = vld [vmem:[#allocation7 + $0x48] sm:$0xff]  ;;  %v377_v15 = vld [vmem:[#allocation7 + $0x40] sm:$0xff]  ;;  %v393_v16 = vld [vmem:[#allocation8 + $0x38] sm:$0xff] }
  0x52   : > { %424 = vmatpush.msra.mxu1 %v382_v5  ;;  %v376_v17 = vld [vmem:[#allocation7 + $0x38] sm:$0xff]  ;;  %v392_v18 = vld [vmem:[#allocation8 + $0x30] sm:$0xff]  ;;  %v391_v20 = vld [vmem:[#allocation8 + $0x28] sm:$0xff] }
  0x53   : > { %405 = vmatpush.msra.mxu0 %v398_v6  ;;  %v375_v19 = vld [vmem:[#allocation7 + $0x30] sm:$0xff]  ;;  %v374_v21 = vld [vmem:[#allocation7 + $0x28] sm:$0xff]  ;;  %v390_v22 = vld [vmem:[#allocation8 + $0x20] sm:$0xff] }
  0x54   : > { %425 = vmatpush.msra.mxu1 %v381_v7  ;;  %v373_v23 = vld [vmem:[#allocation7 + $0x20] sm:$0xff]  ;;  %v389_v24 = vld [vmem:[#allocation8 + $0x18] sm:$0xff]  ;;  %v388_v26 = vld [vmem:[#allocation8 + $0x10] sm:$0xff] }
  0x55   : > { %406 = vmatpush.msra.mxu0 %v397_v8  ;;  %v372_v25 = vld [vmem:[#allocation7 + $0x18] sm:$0xff]  ;;  %v371_v27 = vld [vmem:[#allocation7 + $0x10] sm:$0xff]  ;;  %v387_v28 = vld [vmem:[#allocation8 + $0x8] sm:$0xff] }
  0x56   : > { %426 = vmatpush.msra.mxu1 %v380_v9  ;;  %v370_v29 = vld [vmem:[#allocation7 + $0x8] sm:$0xff]  ;;  %v386_v30 = vld [vmem:[#allocation8] sm:$0xff]  ;;  %v385_v32 = vld [vmem:[%s321_s18] sm:$0xff]  ;;  %s848_s18 = scalar_lea.hbm %s1153_s7, 16 }
  0x57   : > { %407 = vmatpush.msra.mxu0 %v396_v10  ;;  %v369_v31 = vld [vmem:[#allocation7] sm:$0xff] }
  0x58   : > { %427 = vmatpush.msra.mxu1 %v379_v11  ;;  %v368_v33 = vld [vmem:[%s311_s27] sm:$0xff]  ;;  %s844_s27 = scalar_lea.hbm %s843_s12, 8 }
  0x59   : > { %408 = vmatpush.msra.mxu0 %v395_v12  ;;  %v703_v34 = vld [vmem:[%s1150_s4] ss:$0 sm:$0xff]  ;;  %p845_p1 = scmp.ne.s32.totalorder %s843_s12, %s844_s27  ;;  %p850_p9 = scmp.lt.s32.totalorder %s848_s18, %s844_s27 }
  0x5a   : > { %428 = vmatpush.msra.mxu1 %v378_v13  ;;  %v704_v55 = vld [vmem:[%s1151_s5] ss:$0 sm:$0xff] }
  0x5b   : > { %409 = vmatpush.msra.mxu0 %v394_v14  ;;  %v705_v58 = vld [vmem:[%s1152_s6] ss:$0 sm:$0xff]  ;;  %p846_p3 = pnand %p845_p1, %p1021_p4  ;;  %p851_p8 = por %p850_p9, %p849_p7 }
  0x5c   : > { %429 = vmatpush.msra.mxu1 %v377_v15 }
  0x5d   : > { %410 = vmatpush.msra.mxu0 %v393_v16  ;;  %p847_p12 = pneg %p846_p3 }
  0x5e   : > { %430 = vmatpush.msra.mxu1 %v376_v17 }
  0x5f   : > { %411 = vmatpush.msra.mxu0 %v392_v18  ;;  %p852_p10 = pnand %p851_p8, %p847_p12 }
  0x60   : > { %431 = vmatpush.msra.mxu1 %v375_v19 }
  0x61   : > { %412 = vmatpush.msra.mxu0 %v391_v20 }
  0x62   : > { %432 = vmatpush.msra.mxu1 %v374_v21 }
  0x63   : > { %413 = vmatpush.msra.mxu0 %v390_v22 }
  0x64   : > { %433 = vmatpush.msra.mxu1 %v373_v23 }
  0x65   : > { %414 = vmatpush.msra.mxu0 %v389_v24 }
  0x66   : > { %434 = vmatpush.msra.mxu1 %v372_v25 }
  0x67   : > { %415 = vmatpush.msra.mxu0 %v388_v26 }
  0x68   : > { %435 = vmatpush.msra.mxu1 %v371_v27 }
  0x69   : > { %416 = vmatpush.msra.mxu0 %v387_v28 }
  0x6a   : > { %436 = vmatpush.msra.mxu1 %v370_v29 }
  0x6b   : > { %417 = vmatpush.msra.mxu0 %v386_v30 }
  0x6c   : > { %437 = vmatpush.msra.mxu1 %v369_v31  ;;  %418 = vmatmul.f32.vlgmr.msra.gmra.mxu0 %v385_v32 }
  0x6d   : > { %438 = vmatmul.f32.vlgmr.msra.gmra.mxu1 %v368_v33 }
  0xe9   : > { %v419_v35 = vpop.f32.mrf.mxu0 }
  0xea   : > { %v439_v36 = vpop.f32.mrf.mxu1 }
  0xeb   : > { %v440_v37 = vadd.f32 %v439_v36, %v419_v35 }
  0xed   : > { %v446_v38 = vadd.f32 %v703_v34, %v440_v37 }
  0xef   : > { %447 = vadd.xlane.f32.xlu0 %v446_v38  ;;  %v449_v39 = vmul.f32 %v446_v38, %v446_v38 }
  0xf7   : > { %450 = vadd.xlane.f32.xlu0 %v449_v39 }
 0x162   : > { %v448_v40 = vpop.xlane.xlu0 %447 }
 0x163   : > { %v452_v41 = vmul.f32 0.0078125, %v448_v40 }
 0x165   : > { %v454_v43 = vmul.f32 %v452_v41, %v452_v41  ;;  %v468_v54 = vsub.f32 %v446_v38, %v452_v41 }
 0x16a   : > { %v451_v42 = vpop.xlane.xlu0 %450 }
 0x16b   : > { %v453_v44 = vmul.f32 0.0078125, %v451_v42 }
 0x16d   : > { %v455_v45 = vsub.f32 %v453_v44, %v454_v43 }
 0x16f   : > { %v456_v46 = vmax.f32 %v455_v45, 0.0 }
 0x171   : > { %v457_v47 = vadd.f32 1e-05, %v456_v46 }
 0x173   : > { %706 = vrsqrt.f32 %v457_v47  ;;  %vm464_vm1 = vweird.f32 %v457_v47 }
 0x179   : > { %v707_v48 = vpop.eup %706 }
 0x17a   : > { %v459_v49 = vmul.f32 %v707_v48, %v457_v47  ;;  %vm465_vm0 = vweird.f32 %v707_v48 }
 0x17b   : > { %vm466_vm2 = vmor %vm464_vm1, %vm465_vm0 }
 0x17c   : > { %v460_v50 = vmul.f32 %v707_v48, %v459_v49 }
 0x17e   : > { %v461_v51 = vmul.f32 0.5, %v460_v50 }
 0x180   : > { %v462_v52 = vsub.f32 1.5, %v461_v51 }
 0x182   : > { %v463_v53 = vmul.f32 %v707_v48, %v462_v52 }
 0x184   : > { %v467_v56 = vsel %vm466_vm2, %v707_v48, %v463_v53 }
 0x185   : > { %v469_v57 = vmul.f32 %v468_v54, %v467_v56 }
 0x187   : > { %v474_v59 = vmul.f32 %v704_v55, %v469_v57 }
 0x189   : > { %v479_v60 = vadd.f32 %v705_v58, %v474_v59 }
 0x18b   : > { %v480_v61 = vmax.f32 %v479_v60, 0.0 }
 0x18d   : > { %481 = vst [vmem:[%s367_s8] sm:$0xff] %v480_v61 }
 0x18e   : > { %855 = shalt.err (!%p852_p10)
}
 0x18f   : > { %641 = dma.vmem_to_hbm [thread:$0]  (%p1021_p4), %s496_s17, 128, %s498_s2, %s483_s26  }
 0x190 PF: > { %s1172_s3 = sld [smem:[#allocation17_spill]]  ;;  %s509_s19 = sand.u32 1, %s894_s24  }
 0x191   : > { %s510_s21 = scalar_lea.sflag [#allocation4], %s509_s19 }
 0x196   : > { %p1173_p11 = scmp.ge.s32.totalorder %s1172_s3, 2 }
 0x198   : > { %p658_p5 = pnand %p1173_p11, %p1025_p6 }
 0x19a   : > { %p659_p13 = pneg %p658_p5 }
 0x19c   : > { %889 = dma.done.wait (%p659_p13), %s510_s21, 128  }
 0x19d   : > { %891 = vsyncadd (%p659_p13), %s510_s21, 4294967168  ;;  %s1174_s27 = sld [smem:[#allocation18_spill]]  ;;  %s1177_s24 = smov %s898_s25 }
 0x19e   : > { %s1175_s22 = sld [smem:[#allocation16_spill]] }
 0x19f   : > { %s1176_s26 = sld [smem:[#allocation19_spill]] }
 0x1a3   : > { %p24_p0 = scmp.ge.s32.totalorder %s1174_s27, 4  }
 0x1a4   : > { %s1178_s25 = smov %s1175_s22 }
 0x1a5   :  { %26 = sbr.rel (!%p24_p0) target bundleno = 11 (0xb), region = 114 }
 0x1aa   :  { %516 = vsyncpa [#allocation3], 1 }
 0x1ab   :  { %518 = vsyncpa [#allocation3 + $0x1], 1 }
 0x1ac   :  { %519 = vsyncpa [#allocation6], 1 }
 0x1ad   :  { %521 = vsyncpa [#allocation6 + $0x1], 1 }
 0x1ae   :  { %522 = vsyncpa [#allocation9], 1 }
 0x1af   :  { %523 = vsyncpa [#allocation4], 1 }
 0x1b0   :  { %525 = vsyncpa [#allocation4 + $0x1], 1 }

</bundles_post_ra>
